<compile_context>
chip_gen: v6e
topology: v6e:2x2x1
jax: 0.10.0
libtpu: 0.0.40
codegen_flags: <defaults>
</compile_context>

<pallas_src>
import functools

import numpy as np
import jax
import jax.numpy as jnp
from jax.experimental import pallas as pl
from jax.experimental.pallas import tpu as pltpu

BASE_RESONANCE = 0.02
RES_FACTOR = (1.0 - BASE_RESONANCE) * 0.99

# Sized against v7x's 64 MiB per-TC VMEM (v5e/v6e have 128 MiB).
_VMEM_BUDGET_BYTES = 40 * 1024 * 1024
_VMEM_LIMIT_BYTES = 48 * 1024 * 1024

_LANE_CHUNK = 512   # samples-axis chunk per FIR pass (f32 lanes, multiple of 128)
_ROW_CHUNK = 8      # rows per register-resident FIR accumulator (one sublane group)
_HALO = 128         # lanes of previous-chunk resonance carried into each chunk (>= n_frames-1)


def _round_up(x, m):
    return ((x + m - 1) // m) * m


# ----------------------------------------------------------------------------
# Kernel
# ----------------------------------------------------------------------------
def resonance_bank_kernel(sel_ref, init_ref, fsel_ref,
                          filters_ref, wdec_ref, bdec_ref, ressamp_ref,
                          cumsum_ref, interp_ref, out_ref,
                          *, n_frames, lane_chunk, row_chunk):
    """One (TILE_M, N_pad) row-tile of ResonanceBank.forward."""
    f32 = jnp.float32
    tm, n_pad = out_ref.shape
    F = n_frames

    # ---- filter path: (TM,R)@(R,F) on the MXU (hamming window pre-folded) ----
    filt = jnp.dot(fsel_ref[...], filters_ref[...], preferred_element_type=f32)   # (TM, F)

    # ---- decay path: Linear -> sigmoid -> affine -> log -> cumsum -> exp (f32) ----
    z = jnp.dot(init_ref[...], wdec_ref[...], preferred_element_type=f32) + bdec_ref[...]
    d = 0.5 + 0.5 * jnp.tanh(0.5 * z)          # exact sigmoid, single EUP op
    d = BASE_RESONANCE + d * RES_FACTOR
    d = jnp.log(1e-12 + d)
    d = jnp.dot(d, cumsum_ref[...], preferred_element_type=f32)    # cumsum as matmul
    d = jnp.exp(d)                                                 # (TM, F) decay envelope
    d_b = d.astype(jnp.bfloat16)               # bf16 operand for the amp-upsample matmul

    sel = sel_ref[...]                         # (TM, R_pad) bf16, reused for every chunk

    # ---- samples axis in lane chunks: per-chunk MXU matmuls + register-resident FIR ----
    # Causal FIR out[n] = sum_k filt[k] * res[n-k] with an explicit 128-lane halo
    # carried from the previous chunk (zeros for chunk 0): rolls never wrap real data.
    prev_tail = jnp.zeros((tm, _HALO), dtype=f32)
    for c0 in range(0, n_pad, lane_chunk):
        cc = min(lane_chunk, n_pad - c0)
        res_c = jnp.dot(sel, ressamp_ref[:, c0:c0 + cc], preferred_element_type=f32)
        amp_c = jnp.dot(d_b, interp_ref[:, c0:c0 + cc], preferred_element_type=f32)
        res_c = res_c * amp_c                                      # (TM, cc) f32

        ext = jnp.concatenate([prev_tail, res_c], axis=1)          # (TM, cc + 128)

        for r0 in range(0, tm, row_chunk):
            ext_r = ext[r0:r0 + row_chunk, :]                      # (8, cc+128)
            filt_r = filt[r0:r0 + row_chunk, :]                    # (8, F)
            acc = filt_r[:, 0:1] * ext_r[:, _HALO:_HALO + cc]      # vreg-resident accumulator
            for k in range(1, F):
                tap = pltpu.roll(ext_r, shift=k, axis=1)[:, _HALO:_HALO + cc]
                acc = acc + filt_r[:, k:k + 1] * tap
            out_ref[r0:r0 + row_chunk, c0:c0 + cc] = acc.astype(out_ref.dtype)
        # TODO(synk): for n_frames > ~32 switch the unrolled tap loop to
        #   lax.fori_loop(..., unroll=8) with a dynamic roll shift to bound
        #   trace size / vreg live ranges.
        # TODO(synk): on v6e/v7x a bf16 tap path (roll/mul in bf16, f32 acc)
        #   would ~halve XLU/VPU work, at the cost of bf16-accumulation error.

        prev_tail = res_c[:, cc - _HALO:cc]

    # TODO(synk): fft_based_resonance=True branch
    # (freq_domain_transfer_function_to_resonance: irfft with random start
    #  phases + overlap_add) has no clean Pallas equivalent and is not needed
    #  for the default forward path.


# ----------------------------------------------------------------------------
# Host-side constants (vectorized numpy, cached per shape)
# ----------------------------------------------------------------------------
@functools.lru_cache(maxsize=None)
def _bank_constants(n_frames, n_samples, n_pad):
    F, N = n_frames, n_samples
    n = np.arange(F)
    # torch.hamming_window default (periodic=True)
    hamming = (0.54 - 0.46 * np.cos(2.0 * np.pi * n / F)).astype(np.float32)
    # cumsum along frames as a matmul with an upper-triangular ones matrix
    cumsum_mat = np.triu(np.ones((F, F), dtype=np.float32))
    # F.interpolate(mode='linear', align_corners=False) as an (F, N_pad) matrix
    idx = np.arange(N)
    src = np.maximum((idx + 0.5) * (F / N) - 0.5, 0.0)
    i0 = np.minimum(np.floor(src).astype(np.int64), F - 1)
    i1 = np.minimum(i0 + 1, F - 1)
    w1 = (src - i0).astype(np.float32)
    interp = np.zeros((F, n_pad), dtype=np.float32)
    np.add.at(interp, (i0, idx), (1.0 - w1).astype(np.float32))
    np.add.at(interp, (i1, idx), w1)
    return (jnp.asarray(hamming),
            jnp.asarray(cumsum_mat),
            jnp.asarray(interp).astype(jnp.bfloat16))


def _vmem_estimate_bytes(tile_m, r_pad, n_frames, n_pad, lane_chunk, out_itemsize):
    """Pessimistic (everything double-buffered) resident-VMEM estimate."""
    bf16, f32 = 2, 4
    cc = min(lane_chunk, n_pad)
    est = 0
    est += 2 * 3 * tile_m * r_pad * bf16            # sel/init/fsel tiles (double-buffered)
    est += 2 * tile_m * n_pad * out_itemsize        # output tile (double-buffered)
    est += 2 * (2 * r_pad * n_frames * bf16)        # filters + w_decay
    est += 2 * (n_frames * f32)                     # b_decay
    est += 2 * (n_frames * n_frames * f32)          # cumsum matrix
    est += 2 * (r_pad * n_pad * bf16)               # res_samples
    est += 2 * (n_frames * n_pad * bf16)            # interp matrix
    est += 5 * tile_m * (cc + _HALO) * f32          # per-chunk res/amp/ext/halo temporaries
    est += 4 * tile_m * n_frames * f32              # filt / decay temporaries
    return est


# ----------------------------------------------------------------------------
# Wrapper
# ----------------------------------------------------------------------------
def resonance_bank_forward(selection, initial_selection, filter_selection,
                           filters, w_decay, b_decay, res_samples, n_frames,
                           tile_m=None, lane_chunk=_LANE_CHUNK,
                           out_dtype=jnp.float32):
    """ResonanceBank.forward (fft_based_resonance=False) on TPU via Pallas."""
    B, E, R = selection.shape
    N = res_samples.shape[-1]
    F = int(n_frames)
    M = B * E

    assert 1 <= F <= _HALO, f"n_frames={F} must be <= {_HALO} (single 128-lane FIR halo)"

    # Lane-dense padded sizes.  R padded to x128 so the selection tiles and the
    # MXU K-dim are dense; N padded to x128 for unmasked output stores.
    N_pad = _round_up(N, 128)
    R_pad = _round_up(R, 128)
    if tile_m is None:
        # Keep the rows grid >= 2 steps whenever possible so both v7x
        # TensorCores get work via dimension_semantics=("parallel",).
        # TODO(synk): on v6e (128 MiB VMEM, 256-wide MXU) tile_m=256 is worth trying.
        tile_m = min(128, _round_up(max((M + 1) // 2, 1), 8))
    TILE_M = tile_m
    assert TILE_M % 8 == 0
    M_pad = _round_up(M, TILE_M)
    lane_chunk = max(128, min(_round_up(lane_chunk, 128), N_pad))

    est = _vmem_estimate_bytes(TILE_M, R_pad, F, N_pad, lane_chunk,
                               jnp.dtype(out_dtype).itemsize)
    assert est <= _VMEM_BUDGET_BYTES, (
        f"VMEM footprint estimate {est / 2**20:.1f} MiB exceeds the "
        f"{_VMEM_BUDGET_BYTES / 2**20:.0f} MiB budget; "
        "TODO(synk): add a grid axis over sample chunks (res_samples / interp "
        "blocked along N with the 128-lane halo carried in scratch) for very "
        "large n_samples * n_resonances.")

    def pad_rows(x):
        x = x.reshape(M, R).astype(jnp.bfloat16)
        return jnp.pad(x, ((0, M_pad - M), (0, R_pad - R)))

    sel = pad_rows(selection)
    init = pad_rows(initial_selection)
    fsel = pad_rows(filter_selection)

    hamming, cumsum_mat, interp = _bank_constants(F, N, N_pad)

    # Fold the periodic hamming window into the filter bank:
    # (fsel @ filters) * h == fsel @ (filters * diag(h))
    filters_h = jnp.pad(
        (filters.astype(jnp.float32) * hamming[None, :]).astype(jnp.bfloat16),
        ((0, R_pad - R), (0, 0)))                                  # (R_pad, F)
    w_decay_b = jnp.pad(w_decay.astype(jnp.bfloat16), ((0, R_pad - R), (0, 0)))
    b_decay_r = b_decay.reshape(1, F).astype(jnp.float32)          # (1, F)
    ressamp = jnp.pad(res_samples.astype(jnp.bfloat16),
                      ((0, R_pad - R), (0, N_pad - N)))            # (R_pad, N_pad)

    kernel = functools.partial(resonance_bank_kernel, n_frames=F,
                               lane_chunk=lane_chunk, row_chunk=_ROW_CHUNK)

    def build(single_buffer_consts):
        const_kwargs = ({"pipeline_mode": pl.Buffered(1)}
                        if single_buffer_consts else {})

        def row_spec():
            return pl.BlockSpec((TILE_M, R_pad), lambda i: (i, 0))

        def const_spec(shape):
            return pl.BlockSpec(shape, lambda i: (0, 0), **const_kwargs)

        return pl.pallas_call(
            kernel,
            out_shape=jax.ShapeDtypeStruct((M_pad, N_pad), out_dtype),
            grid=(M_pad // TILE_M,),
            in_specs=[
                row_spec(), row_spec(), row_spec(),
                const_spec((R_pad, F)), const_spec((R_pad, F)), const_spec((1, F)),
                const_spec((R_pad, N_pad)),
                const_spec((F, F)), const_spec((F, N_pad)),
            ],
            out_specs=pl.BlockSpec((TILE_M, N_pad), lambda i: (i, 0)),
            compiler_params=pltpu.CompilerParams(
                dimension_semantics=("parallel",),
                vmem_limit_bytes=_VMEM_LIMIT_BYTES),
        )

    operands = (sel, init, fsel, filters_h, w_decay_b, b_decay_r, ressamp,
                cumsum_mat, interp)
    try:
        # Constant-index operands are fetched once; single-buffer them to save
        # VMEM (v7x headroom).  Fall back to default buffering if the installed
        # jax rejects Buffered(1).
        out = build(single_buffer_consts=True)(*operands)
    except Exception:
        out = build(single_buffer_consts=False)(*operands)

    return out[:M, :N].reshape(B, E, N)


# ----------------------------------------------------------------------------
# Pure-JAX reference (mirrors the PyTorch forward, including a literal
# rfft/irfft re-implementation of fft_convolve)
# ----------------------------------------------------------------------------
def _fft_convolve_ref(a, b):
    n = a.shape[-1]
    pad = [(0, 0)] * (a.ndim - 1) + [(0, n)]
    spec = jnp.fft.rfft(jnp.pad(a, pad), axis=-1) * jnp.fft.rfft(jnp.pad(b, pad), axis=-1)
    return jnp.fft.irfft(spec, axis=-1)[..., :n]


def reference_forward(selection, initial_selection, filter_selection,
                      filters, w_decay, b_decay, res_samples, n_frames):
    B, E, R = selection.shape
    N = res_samples.shape[-1]
    F = n_frames
    filt = jnp.einsum('ber,rf->bef', filter_selection, filters)
    n = jnp.arange(F)
    hamming = 0.54 - 0.46 * jnp.cos(2.0 * jnp.pi * n / F)
    filt = filt * hamming
    d = jnp.einsum('ber,rf->bef', initial_selection, w_decay) + b_decay
    d = jax.nn.sigmoid(d)
    d = BASE_RESONANCE + d * RES_FACTOR
    d = jnp.exp(jnp.cumsum(jnp.log(1e-12 + d), axis=-1))
    src = jnp.maximum((jnp.arange(N) + 0.5) * (F / N) - 0.5, 0.0)
    i0 = jnp.clip(jnp.floor(src).astype(jnp.int32), 0, F - 1)
    i1 = jnp.minimum(i0 + 1, F - 1)
    l1 = src - i0
    amp = d[..., i0] * (1.0 - l1) + d[..., i1] * l1
    res = jnp.einsum('ber,rn->ben', selection, res_samples)
    res = res * amp
    filt_padded = jnp.pad(filt, ((0, 0), (0, 0), (0, N - F)))
    return _fft_convolve_ref(filt_padded, res)


# ----------------------------------------------------------------------------
# Test
# ----------------------------------------------------------------------------
def _run_case(key, B, E, n_resonances, n_frames, n_samples,
              tile_m=None, lane_chunk=_LANE_CHUNK):
    ks = jax.random.split(key, 7)
    res_samples = jax.random.normal(ks[0], (n_resonances, n_samples), jnp.float32) * 0.1
    filters = jax.random.uniform(ks[1], (n_resonances, n_frames), jnp.float32, -1.0, 1.0)
    w_decay = jax.random.normal(ks[2], (n_resonances, n_frames), jnp.float32) / np.sqrt(n_resonances)
    b_decay = jax.random.normal(ks[3], (n_frames,), jnp.float32) * 0.01
    selection = jax.random.normal(ks[4], (B, E, n_resonances), jnp.float32)
    initial_selection = jax.random.normal(ks[5], (B, E, n_resonances), jnp.float32)
    filter_selection = jax.random.normal(ks[6], (B, E, n_resonances), jnp.float32)

    out = resonance_bank_forward(selection, initial_selection, filter_selection,
                                 filters, w_decay, b_decay, res_samples, n_frames,
                                 tile_m=tile_m, lane_chunk=lane_chunk)
    out = jax.block_until_ready(out)
    assert out.shape == (B, E, n_samples)

    # Reference on the same bf16-quantized inputs (the kernel intentionally
    # feeds the MXU bf16 operands with f32 accumulation).
    def q(x):
        return x.astype(jnp.bfloat16).astype(jnp.float32)

    # The kernel stores the hamming-windowed filter bank in bf16 (fold-then-
    # quantize); mirror that intentional quantization in the reference input.
    hamm = (0.54 - 0.46 * np.cos(2.0 * np.pi * np.arange(n_frames) / n_frames)).astype(np.float32)
    filters_eff = q(filters * hamm[None, :]) / hamm[None, :]

    ref = reference_forward(q(selection), q(initial_selection), q(filter_selection),
                            filters_eff, q(w_decay), b_decay, q(res_samples), n_frames)
    out_np = np.asarray(out)
    ref_np = np.asarray(ref)
    max_err = float(np.max(np.abs(out_np - ref_np)))
    assert np.allclose(out_np, ref_np, rtol=2e-2, atol=2e-2), max_err
    return out


if __name__ == "__main__":
    key = jax.random.PRNGKey(0)
    k1, k2 = jax.random.split(key)
    # Small, unaligned config (exercises row/lane/R padding; single lane chunk).
    _run_case(k1, B=2, E=2, n_resonances=16, n_frames=8, n_samples=64)
    # Multi-tile rows grid (TILE_M=8 -> grid of 2) and multiple lane chunks
    # (N_pad=1024 / lane_chunk=256 -> 4 chunks) exercising the FIR halo carry.
    _run_case(k2, B=2, E=8, n_resonances=32, n_frames=16, n_samples=1024,
              lane_chunk=256)
    print("KERNEL_OK")
</pallas_src>

<mosaic_0001>
module attributes {stable_mosaic.version = 11 : i64} {
  func.func @resonance_bank_kernel(%arg0: i32, %arg1: memref<8x128xbf16, #tpu.memory_space<vmem>>, %arg2: memref<8x128xbf16, #tpu.memory_space<vmem>>, %arg3: memref<8x128xbf16, #tpu.memory_space<vmem>>, %arg4: memref<128x8xbf16, #tpu.memory_space<vmem>>, %arg5: memref<128x8xbf16, #tpu.memory_space<vmem>>, %arg6: memref<1x8xf32, #tpu.memory_space<vmem>>, %arg7: memref<128x128xbf16, #tpu.memory_space<vmem>>, %arg8: memref<8x8xf32, #tpu.memory_space<vmem>>, %arg9: memref<8x128xbf16, #tpu.memory_space<vmem>>, %arg10: memref<8x128xf32, #tpu.memory_space<vmem>>) attributes {dimension_semantics = [#tpu.dimension_semantics<parallel>], iteration_bounds = array<i64: 1>, scalar_prefetch = 0 : i64, scratch_operands = 0 : i64, tpu.core_type = #tpu.core_type<tc>, window_params = [{transform_indices = @transform_0, window_bounds = array<i64: 8, 128>}, {transform_indices = @transform_1, window_bounds = array<i64: 8, 128>}, {transform_indices = @transform_2, window_bounds = array<i64: 8, 128>}, {pipeline_mode = #tpu.pipeline_mode<synchronous>, transform_indices = @transform_3, window_bounds = array<i64: 128, 8>}, {pipeline_mode = #tpu.pipeline_mode<synchronous>, transform_indices = @transform_4, window_bounds = array<i64: 128, 8>}, {pipeline_mode = #tpu.pipeline_mode<synchronous>, transform_indices = @transform_5, window_bounds = array<i64: 1, 8>}, {pipeline_mode = #tpu.pipeline_mode<synchronous>, transform_indices = @transform_6, window_bounds = array<i64: 128, 128>}, {pipeline_mode = #tpu.pipeline_mode<synchronous>, transform_indices = @transform_7, window_bounds = array<i64: 8, 8>}, {pipeline_mode = #tpu.pipeline_mode<synchronous>, transform_indices = @transform_8, window_bounds = array<i64: 8, 128>}, {transform_indices = @transform_9, window_bounds = array<i64: 8, 128>}]} {
    %c0 = arith.constant 0 : index
    %c0_0 = arith.constant 0 : index
    %0 = vector.load %arg3[%c0, %c0_0] : memref<8x128xbf16, #tpu.memory_space<vmem>>, vector<8x128xbf16>
    %c0_1 = arith.constant 0 : index
    %c0_2 = arith.constant 0 : index
    %1 = vector.load %arg4[%c0_1, %c0_2] : memref<128x8xbf16, #tpu.memory_space<vmem>>, vector<128x8xbf16>
    %cst = arith.constant dense<0.000000e+00> : vector<8x8xf32>
    %2 = tpu.matmul %0, %1, %cst {dimension_numbers = #tpu.dot_dimension_numbers<[1], [0], [0], [1], [0, 0, 1, 1], [], []>} : vector<8x128xbf16>, vector<128x8xbf16>, vector<8x8xf32> -> vector<8x8xf32>
    %c0_3 = arith.constant 0 : index
    %c0_4 = arith.constant 0 : index
    %3 = vector.load %arg2[%c0_3, %c0_4] : memref<8x128xbf16, #tpu.memory_space<vmem>>, vector<8x128xbf16>
    %c0_5 = arith.constant 0 : index
    %c0_6 = arith.constant 0 : index
    %4 = vector.load %arg5[%c0_5, %c0_6] : memref<128x8xbf16, #tpu.memory_space<vmem>>, vector<128x8xbf16>
    %cst_7 = arith.constant dense<0.000000e+00> : vector<8x8xf32>
    %5 = tpu.matmul %3, %4, %cst_7 {dimension_numbers = #tpu.dot_dimension_numbers<[1], [0], [0], [1], [0, 0, 1, 1], [], []>} : vector<8x128xbf16>, vector<128x8xbf16>, vector<8x8xf32> -> vector<8x8xf32>
    %c0_8 = arith.constant 0 : index
    %c0_9 = arith.constant 0 : index
    %6 = vector.load %arg6[%c0_8, %c0_9] : memref<1x8xf32, #tpu.memory_space<vmem>>, vector<1x8xf32>
    %7 = vector.broadcast %6 : vector<1x8xf32> to vector<8x8xf32>
    %8 = arith.addf %5, %7 : vector<8x8xf32>
    %cst_10 = arith.constant 5.000000e-01 : f32
    %9 = vector.broadcast %cst_10 : f32 to vector<8x8xf32>
    %10 = arith.mulf %9, %8 : vector<8x8xf32>
    %11 = math.tanh %10 : vector<8x8xf32>
    %cst_11 = arith.constant 5.000000e-01 : f32
    %12 = vector.broadcast %cst_11 : f32 to vector<8x8xf32>
    %13 = arith.mulf %12, %11 : vector<8x8xf32>
    %cst_12 = arith.constant 5.000000e-01 : f32
    %14 = vector.broadcast %cst_12 : f32 to vector<8x8xf32>
    %15 = arith.addf %14, %13 : vector<8x8xf32>
    %cst_13 = arith.constant 9.702000e-01 : f32
    %16 = vector.broadcast %cst_13 : f32 to vector<8x8xf32>
    %17 = arith.mulf %15, %16 : vector<8x8xf32>
    %cst_14 = arith.constant 2.000000e-02 : f32
    %18 = vector.broadcast %cst_14 : f32 to vector<8x8xf32>
    %19 = arith.addf %18, %17 : vector<8x8xf32>
    %cst_15 = arith.constant 9.99999996E-13 : f32
    %20 = vector.broadcast %cst_15 : f32 to vector<8x8xf32>
    %21 = arith.addf %20, %19 : vector<8x8xf32>
    %22 = math.log %21 : vector<8x8xf32>
    %c0_16 = arith.constant 0 : index
    %c0_17 = arith.constant 0 : index
    %23 = vector.load %arg8[%c0_16, %c0_17] : memref<8x8xf32, #tpu.memory_space<vmem>>, vector<8x8xf32>
    %cst_18 = arith.constant dense<0.000000e+00> : vector<8x8xf32>
    %24 = tpu.matmul %22, %23, %cst_18 {dimension_numbers = #tpu.dot_dimension_numbers<[1], [0], [0], [1], [0, 0, 1, 1], [], []>} : vector<8x8xf32>, vector<8x8xf32>, vector<8x8xf32> -> vector<8x8xf32>
    %25 = math.exp %24 : vector<8x8xf32>
    %26 = arith.truncf %25 : vector<8x8xf32> to vector<8x8xbf16>
    %c0_19 = arith.constant 0 : index
    %c0_20 = arith.constant 0 : index
    %27 = vector.load %arg1[%c0_19, %c0_20] : memref<8x128xbf16, #tpu.memory_space<vmem>>, vector<8x128xbf16>
    %cst_21 = arith.constant 0.000000e+00 : f32
    %28 = vector.broadcast %cst_21 : f32 to vector<8x128xf32>
    %c0_22 = arith.constant 0 : index
    %c0_23 = arith.constant 0 : index
    %29 = vector.load %arg7[%c0_22, %c0_23] : memref<128x128xbf16, #tpu.memory_space<vmem>>, vector<128x128xbf16>
    %cst_24 = arith.constant dense<0.000000e+00> : vector<8x128xf32>
    %30 = tpu.matmul %27, %29, %cst_24 {dimension_numbers = #tpu.dot_dimension_numbers<[1], [0], [0], [1], [0, 0, 1, 1], [], []>} : vector<8x128xbf16>, vector<128x128xbf16>, vector<8x128xf32> -> vector<8x128xf32>
    %c0_25 = arith.constant 0 : index
    %c0_26 = arith.constant 0 : index
    %31 = vector.load %arg9[%c0_25, %c0_26] : memref<8x128xbf16, #tpu.memory_space<vmem>>, vector<8x128xbf16>
    %cst_27 = arith.constant dense<0.000000e+00> : vector<8x128xf32>
    %32 = tpu.matmul %26, %31, %cst_27 {dimension_numbers = #tpu.dot_dimension_numbers<[1], [0], [0], [1], [0, 0, 1, 1], [], []>} : vector<8x8xbf16>, vector<8x128xbf16>, vector<8x128xf32> -> vector<8x128xf32>
    %33 = arith.mulf %30, %32 : vector<8x128xf32>
    %34 = tpu.concatenate %28, %33 in 1 : vector<8x128xf32>, vector<8x128xf32> -> vector<8x256xf32>
    %35 = vector.extract_strided_slice %2 {offsets = [0, 0], sizes = [8, 1], strides = [1, 1]} : vector<8x8xf32> to vector<8x1xf32>
    %36 = vector.extract_strided_slice %34 {offsets = [0, 128], sizes = [8, 128], strides = [1, 1]} : vector<8x256xf32> to vector<8x128xf32>
    %37 = vector.broadcast %35 : vector<8x1xf32> to vector<8x128xf32>
    %38 = arith.mulf %37, %36 : vector<8x128xf32>
    %c1_i32 = arith.constant 1 : i32
    %39 = tpu.dynamic_rotate %34 by %c1_i32 dim 1 : vector<8x256xf32>, i32 -> vector<8x256xf32>
    %40 = vector.extract_strided_slice %39 {offsets = [0, 128], sizes = [8, 128], strides = [1, 1]} : vector<8x256xf32> to vector<8x128xf32>
    %41 = vector.extract_strided_slice %2 {offsets = [0, 1], sizes = [8, 1], strides = [1, 1]} : vector<8x8xf32> to vector<8x1xf32>
    %42 = vector.broadcast %41 : vector<8x1xf32> to vector<8x128xf32>
    %43 = arith.mulf %42, %40 : vector<8x128xf32>
    %44 = arith.addf %38, %43 : vector<8x128xf32>
    %c2_i32 = arith.constant 2 : i32
    %45 = tpu.dynamic_rotate %34 by %c2_i32 dim 1 : vector<8x256xf32>, i32 -> vector<8x256xf32>
    %46 = vector.extract_strided_slice %45 {offsets = [0, 128], sizes = [8, 128], strides = [1, 1]} : vector<8x256xf32> to vector<8x128xf32>
    %47 = vector.extract_strided_slice %2 {offsets = [0, 2], sizes = [8, 1], strides = [1, 1]} : vector<8x8xf32> to vector<8x1xf32>
    %48 = vector.broadcast %47 : vector<8x1xf32> to vector<8x128xf32>
    %49 = arith.mulf %48, %46 : vector<8x128xf32>
    %50 = arith.addf %44, %49 : vector<8x128xf32>
    %c3_i32 = arith.constant 3 : i32
    %51 = tpu.dynamic_rotate %34 by %c3_i32 dim 1 : vector<8x256xf32>, i32 -> vector<8x256xf32>
    %52 = vector.extract_strided_slice %51 {offsets = [0, 128], sizes = [8, 128], strides = [1, 1]} : vector<8x256xf32> to vector<8x128xf32>
    %53 = vector.extract_strided_slice %2 {offsets = [0, 3], sizes = [8, 1], strides = [1, 1]} : vector<8x8xf32> to vector<8x1xf32>
    %54 = vector.broadcast %53 : vector<8x1xf32> to vector<8x128xf32>
    %55 = arith.mulf %54, %52 : vector<8x128xf32>
    %56 = arith.addf %50, %55 : vector<8x128xf32>
    %c4_i32 = arith.constant 4 : i32
    %57 = tpu.dynamic_rotate %34 by %c4_i32 dim 1 : vector<8x256xf32>, i32 -> vector<8x256xf32>
    %58 = vector.extract_strided_slice %57 {offsets = [0, 128], sizes = [8, 128], strides = [1, 1]} : vector<8x256xf32> to vector<8x128xf32>
    %59 = vector.extract_strided_slice %2 {offsets = [0, 4], sizes = [8, 1], strides = [1, 1]} : vector<8x8xf32> to vector<8x1xf32>
    %60 = vector.broadcast %59 : vector<8x1xf32> to vector<8x128xf32>
    %61 = arith.mulf %60, %58 : vector<8x128xf32>
    %62 = arith.addf %56, %61 : vector<8x128xf32>
    %c5_i32 = arith.constant 5 : i32
    %63 = tpu.dynamic_rotate %34 by %c5_i32 dim 1 : vector<8x256xf32>, i32 -> vector<8x256xf32>
    %64 = vector.extract_strided_slice %63 {offsets = [0, 128], sizes = [8, 128], strides = [1, 1]} : vector<8x256xf32> to vector<8x128xf32>
    %65 = vector.extract_strided_slice %2 {offsets = [0, 5], sizes = [8, 1], strides = [1, 1]} : vector<8x8xf32> to vector<8x1xf32>
    %66 = vector.broadcast %65 : vector<8x1xf32> to vector<8x128xf32>
    %67 = arith.mulf %66, %64 : vector<8x128xf32>
    %68 = arith.addf %62, %67 : vector<8x128xf32>
    %c6_i32 = arith.constant 6 : i32
    %69 = tpu.dynamic_rotate %34 by %c6_i32 dim 1 : vector<8x256xf32>, i32 -> vector<8x256xf32>
    %70 = vector.extract_strided_slice %69 {offsets = [0, 128], sizes = [8, 128], strides = [1, 1]} : vector<8x256xf32> to vector<8x128xf32>
    %71 = vector.extract_strided_slice %2 {offsets = [0, 6], sizes = [8, 1], strides = [1, 1]} : vector<8x8xf32> to vector<8x1xf32>
    %72 = vector.broadcast %71 : vector<8x1xf32> to vector<8x128xf32>
    %73 = arith.mulf %72, %70 : vector<8x128xf32>
    %74 = arith.addf %68, %73 : vector<8x128xf32>
    %c7_i32 = arith.constant 7 : i32
    %75 = tpu.dynamic_rotate %34 by %c7_i32 dim 1 : vector<8x256xf32>, i32 -> vector<8x256xf32>
    %76 = vector.extract_strided_slice %75 {offsets = [0, 128], sizes = [8, 128], strides = [1, 1]} : vector<8x256xf32> to vector<8x128xf32>
    %77 = vector.extract_strided_slice %2 {offsets = [0, 7], sizes = [8, 1], strides = [1, 1]} : vector<8x8xf32> to vector<8x1xf32>
    %78 = vector.broadcast %77 : vector<8x1xf32> to vector<8x128xf32>
    %79 = arith.mulf %78, %76 : vector<8x128xf32>
    %80 = arith.addf %74, %79 : vector<8x128xf32>
    %c0_28 = arith.constant 0 : index
    %c0_29 = arith.constant 0 : index
    %81 = vector.load %arg10[%c0_28, %c0_29] : memref<8x128xf32, #tpu.memory_space<vmem>>, vector<8x128xf32>
    tpu.vector_store %arg10[%c0_28, %c0_29], %80 {strides = array<i32>} : memref<8x128xf32, #tpu.memory_space<vmem>>, vector<8x128xf32>,
    return
  }
  func.func @transform_0(%arg0: i32) -> (i32, i32) {
    %c0_i32 = arith.constant 0 : i32
    %c0_i32_0 = arith.constant 0 : i32
    return %arg0, %c0_i32 : i32, i32
  }
  func.func @transform_1(%arg0: i32) -> (i32, i32) {
    %c0_i32 = arith.constant 0 : i32
    %c0_i32_0 = arith.constant 0 : i32
    return %arg0, %c0_i32 : i32, i32
  }
  func.func @transform_2(%arg0: i32) -> (i32, i32) {
    %c0_i32 = arith.constant 0 : i32
    %c0_i32_0 = arith.constant 0 : i32
    return %arg0, %c0_i32 : i32, i32
  }
  func.func @transform_3(%arg0: i32) -> (i32, i32) {
    %c0_i32 = arith.constant 0 : i32
    %c0_i32_0 = arith.constant 0 : i32
    %c0_i32_1 = arith.constant 0 : i32
    return %c0_i32, %c0_i32_0 : i32, i32
  }
  func.func @transform_4(%arg0: i32) -> (i32, i32) {
    %c0_i32 = arith.constant 0 : i32
    %c0_i32_0 = arith.constant 0 : i32
    %c0_i32_1 = arith.constant 0 : i32
    return %c0_i32, %c0_i32_0 : i32, i32
  }
  func.func @transform_5(%arg0: i32) -> (i32, i32) {
    %c0_i32 = arith.constant 0 : i32
    %c0_i32_0 = arith.constant 0 : i32
    %c0_i32_1 = arith.constant 0 : i32
    return %c0_i32, %c0_i32_0 : i32, i32
  }
  func.func @transform_6(%arg0: i32) -> (i32, i32) {
    %c0_i32 = arith.constant 0 : i32
    %c0_i32_0 = arith.constant 0 : i32
    %c0_i32_1 = arith.constant 0 : i32
    return %c0_i32, %c0_i32_0 : i32, i32
  }
  func.func @transform_7(%arg0: i32) -> (i32, i32) {
    %c0_i32 = arith.constant 0 : i32
    %c0_i32_0 = arith.constant 0 : i32
    %c0_i32_1 = arith.constant 0 : i32
    return %c0_i32, %c0_i32_0 : i32, i32
  }
  func.func @transform_8(%arg0: i32) -> (i32, i32) {
    %c0_i32 = arith.constant 0 : i32
    %c0_i32_0 = arith.constant 0 : i32
    %c0_i32_1 = arith.constant 0 : i32
    return %c0_i32, %c0_i32_0 : i32, i32
  }
  func.func @transform_9(%arg0: i32) -> (i32, i32) {
    %c0_i32 = arith.constant 0 : i32
    %c0_i32_0 = arith.constant 0 : i32
    return %arg0, %c0_i32 : i32, i32
  }
}

module attributes {stable_mosaic.version = 11 : i64} {
  func.func @resonance_bank_kernel(%arg0: i32, %arg1: memref<8x128xbf16, #tpu.memory_space<vmem>>, %arg2: memref<8x128xbf16, #tpu.memory_space<vmem>>, %arg3: memref<8x128xbf16, #tpu.memory_space<vmem>>, %arg4: memref<128x8xbf16, #tpu.memory_space<vmem>>, %arg5: memref<128x8xbf16, #tpu.memory_space<vmem>>, %arg6: memref<1x8xf32, #tpu.memory_space<vmem>>, %arg7: memref<128x128xbf16, #tpu.memory_space<vmem>>, %arg8: memref<8x8xf32, #tpu.memory_space<vmem>>, %arg9: memref<8x128xbf16, #tpu.memory_space<vmem>>, %arg10: memref<8x128xf32, #tpu.memory_space<vmem>>) attributes {dimension_semantics = [#tpu.dimension_semantics<parallel>], iteration_bounds = array<i64: 1>, scalar_prefetch = 0 : i64, scratch_operands = 0 : i64, tpu.core_type = #tpu.core_type<tc>, window_params = [{transform_indices = @transform_0, window_bounds = array<i64: 8, 128>}, {transform_indices = @transform_1, window_bounds = array<i64: 8, 128>}, {transform_indices = @transform_2, window_bounds = array<i64: 8, 128>}, {pipeline_mode = #tpu.pipeline_mode<synchronous>, transform_indices = @transform_3, window_bounds = array<i64: 128, 8>}, {pipeline_mode = #tpu.pipeline_mode<synchronous>, transform_indices = @transform_4, window_bounds = array<i64: 128, 8>}, {pipeline_mode = #tpu.pipeline_mode<synchronous>, transform_indices = @transform_5, window_bounds = array<i64: 1, 8>}, {pipeline_mode = #tpu.pipeline_mode<synchronous>, transform_indices = @transform_6, window_bounds = array<i64: 128, 128>}, {pipeline_mode = #tpu.pipeline_mode<synchronous>, transform_indices = @transform_7, window_bounds = array<i64: 8, 8>}, {pipeline_mode = #tpu.pipeline_mode<synchronous>, transform_indices = @transform_8, window_bounds = array<i64: 8, 128>}, {transform_indices = @transform_9, window_bounds = array<i64: 8, 128>}]} {
    %c0 = arith.constant 0 : index
    %c0_0 = arith.constant 0 : index
    %0 = vector.load %arg3[%c0, %c0_0] : memref<8x128xbf16, #tpu.memory_space<vmem>>, vector<8x128xbf16>
    %c0_1 = arith.constant 0 : index
    %c0_2 = arith.constant 0 : index
    %1 = vector.load %arg4[%c0_1, %c0_2] : memref<128x8xbf16, #tpu.memory_space<vmem>>, vector<128x8xbf16>
    %cst = arith.constant dense<0.000000e+00> : vector<8x8xf32>
    %2 = tpu.matmul %0, %1, %cst {dimension_numbers = #tpu.dot_dimension_numbers<[1], [0], [0], [1], [0, 0, 1, 1], [], []>} : vector<8x128xbf16>, vector<128x8xbf16>, vector<8x8xf32> -> vector<8x8xf32>
    %c0_3 = arith.constant 0 : index
    %c0_4 = arith.constant 0 : index
    %3 = vector.load %arg2[%c0_3, %c0_4] : memref<8x128xbf16, #tpu.memory_space<vmem>>, vector<8x128xbf16>
    %c0_5 = arith.constant 0 : index
    %c0_6 = arith.constant 0 : index
    %4 = vector.load %arg5[%c0_5, %c0_6] : memref<128x8xbf16, #tpu.memory_space<vmem>>, vector<128x8xbf16>
    %cst_7 = arith.constant dense<0.000000e+00> : vector<8x8xf32>
    %5 = tpu.matmul %3, %4, %cst_7 {dimension_numbers = #tpu.dot_dimension_numbers<[1], [0], [0], [1], [0, 0, 1, 1], [], []>} : vector<8x128xbf16>, vector<128x8xbf16>, vector<8x8xf32> -> vector<8x8xf32>
    %c0_8 = arith.constant 0 : index
    %c0_9 = arith.constant 0 : index
    %6 = vector.load %arg6[%c0_8, %c0_9] : memref<1x8xf32, #tpu.memory_space<vmem>>, vector<1x8xf32>
    %7 = vector.broadcast %6 : vector<1x8xf32> to vector<8x8xf32>
    %8 = arith.addf %5, %7 : vector<8x8xf32>
    %cst_10 = arith.constant 5.000000e-01 : f32
    %9 = vector.broadcast %cst_10 : f32 to vector<8x8xf32>
    %10 = arith.mulf %9, %8 : vector<8x8xf32>
    %11 = math.tanh %10 : vector<8x8xf32>
    %cst_11 = arith.constant 5.000000e-01 : f32
    %12 = vector.broadcast %cst_11 : f32 to vector<8x8xf32>
    %13 = arith.mulf %12, %11 : vector<8x8xf32>
    %cst_12 = arith.constant 5.000000e-01 : f32
    %14 = vector.broadcast %cst_12 : f32 to vector<8x8xf32>
    %15 = arith.addf %14, %13 : vector<8x8xf32>
    %cst_13 = arith.constant 9.702000e-01 : f32
    %16 = vector.broadcast %cst_13 : f32 to vector<8x8xf32>
    %17 = arith.mulf %15, %16 : vector<8x8xf32>
    %cst_14 = arith.constant 2.000000e-02 : f32
    %18 = vector.broadcast %cst_14 : f32 to vector<8x8xf32>
    %19 = arith.addf %18, %17 : vector<8x8xf32>
    %cst_15 = arith.constant 9.99999996E-13 : f32
    %20 = vector.broadcast %cst_15 : f32 to vector<8x8xf32>
    %21 = arith.addf %20, %19 : vector<8x8xf32>
    %22 = math.log %21 : vector<8x8xf32>
    %c0_16 = arith.constant 0 : index
    %c0_17 = arith.constant 0 : index
    %23 = vector.load %arg8[%c0_16, %c0_17] : memref<8x8xf32, #tpu.memory_space<vmem>>, vector<8x8xf32>
    %cst_18 = arith.constant dense<0.000000e+00> : vector<8x8xf32>
    %24 = tpu.matmul %22, %23, %cst_18 {dimension_numbers = #tpu.dot_dimension_numbers<[1], [0], [0], [1], [0, 0, 1, 1], [], []>} : vector<8x8xf32>, vector<8x8xf32>, vector<8x8xf32> -> vector<8x8xf32>
    %25 = math.exp %24 : vector<8x8xf32>
    %26 = arith.truncf %25 : vector<8x8xf32> to vector<8x8xbf16>
    %c0_19 = arith.constant 0 : index
    %c0_20 = arith.constant 0 : index
    %27 = vector.load %arg1[%c0_19, %c0_20] : memref<8x128xbf16, #tpu.memory_space<vmem>>, vector<8x128xbf16>
    %cst_21 = arith.constant 0.000000e+00 : f32
    %28 = vector.broadcast %cst_21 : f32 to vector<8x128xf32>
    %c0_22 = arith.constant 0 : index
    %c0_23 = arith.constant 0 : index
    %29 = vector.load %arg7[%c0_22, %c0_23] : memref<128x128xbf16, #tpu.memory_space<vmem>>, vector<128x128xbf16>
    %cst_24 = arith.constant dense<0.000000e+00> : vector<8x128xf32>
    %30 = tpu.matmul %27, %29, %cst_24 {dimension_numbers = #tpu.dot_dimension_numbers<[1], [0], [0], [1], [0, 0, 1, 1], [], []>} : vector<8x128xbf16>, vector<128x128xbf16>, vector<8x128xf32> -> vector<8x128xf32>
    %c0_25 = arith.constant 0 : index
    %c0_26 = arith.constant 0 : index
    %31 = vector.load %arg9[%c0_25, %c0_26] : memref<8x128xbf16, #tpu.memory_space<vmem>>, vector<8x128xbf16>
    %cst_27 = arith.constant dense<0.000000e+00> : vector<8x128xf32>
    %32 = tpu.matmul %26, %31, %cst_27 {dimension_numbers = #tpu.dot_dimension_numbers<[1], [0], [0], [1], [0, 0, 1, 1], [], []>} : vector<8x8xbf16>, vector<8x128xbf16>, vector<8x128xf32> -> vector<8x128xf32>
    %33 = arith.mulf %30, %32 : vector<8x128xf32>
    %34 = tpu.concatenate %28, %33 in 1 : vector<8x128xf32>, vector<8x128xf32> -> vector<8x256xf32>
    %35 = vector.extract_strided_slice %2 {offsets = [0, 0], sizes = [8, 1], strides = [1, 1]} : vector<8x8xf32> to vector<8x1xf32>
    %36 = vector.extract_strided_slice %34 {offsets = [0, 128], sizes = [8, 128], strides = [1, 1]} : vector<8x256xf32> to vector<8x128xf32>
    %37 = vector.broadcast %35 : vector<8x1xf32> to vector<8x128xf32>
    %38 = arith.mulf %37, %36 : vector<8x128xf32>
    %c1_i32 = arith.constant 1 : i32
    %39 = tpu.dynamic_rotate %34 by %c1_i32 dim 1 : vector<8x256xf32>, i32 -> vector<8x256xf32>
    %40 = vector.extract_strided_slice %39 {offsets = [0, 128], sizes = [8, 128], strides = [1, 1]} : vector<8x256xf32> to vector<8x128xf32>
    %41 = vector.extract_strided_slice %2 {offsets = [0, 1], sizes = [8, 1], strides = [1, 1]} : vector<8x8xf32> to vector<8x1xf32>
    %42 = vector.broadcast %41 : vector<8x1xf32> to vector<8x128xf32>
    %43 = arith.mulf %42, %40 : vector<8x128xf32>
    %44 = arith.addf %38, %43 : vector<8x128xf32>
    %c2_i32 = arith.constant 2 : i32
    %45 = tpu.dynamic_rotate %34 by %c2_i32 dim 1 : vector<8x256xf32>, i32 -> vector<8x256xf32>
    %46 = vector.extract_strided_slice %45 {offsets = [0, 128], sizes = [8, 128], strides = [1, 1]} : vector<8x256xf32> to vector<8x128xf32>
    %47 = vector.extract_strided_slice %2 {offsets = [0, 2], sizes = [8, 1], strides = [1, 1]} : vector<8x8xf32> to vector<8x1xf32>
    %48 = vector.broadcast %47 : vector<8x1xf32> to vector<8x128xf32>
    %49 = arith.mulf %48, %46 : vector<8x128xf32>
    %50 = arith.addf %44, %49 : vector<8x128xf32>
    %c3_i32 = arith.constant 3 : i32
    %51 = tpu.dynamic_rotate %34 by %c3_i32 dim 1 : vector<8x256xf32>, i32 -> vector<8x256xf32>
    %52 = vector.extract_strided_slice %51 {offsets = [0, 128], sizes = [8, 128], strides = [1, 1]} : vector<8x256xf32> to vector<8x128xf32>
    %53 = vector.extract_strided_slice %2 {offsets = [0, 3], sizes = [8, 1], strides = [1, 1]} : vector<8x8xf32> to vector<8x1xf32>
    %54 = vector.broadcast %53 : vector<8x1xf32> to vector<8x128xf32>
    %55 = arith.mulf %54, %52 : vector<8x128xf32>
    %56 = arith.addf %50, %55 : vector<8x128xf32>
    %c4_i32 = arith.constant 4 : i32
    %57 = tpu.dynamic_rotate %34 by %c4_i32 dim 1 : vector<8x256xf32>, i32 -> vector<8x256xf32>
    %58 = vector.extract_strided_slice %57 {offsets = [0, 128], sizes = [8, 128], strides = [1, 1]} : vector<8x256xf32> to vector<8x128xf32>
    %59 = vector.extract_strided_slice %2 {offsets = [0, 4], sizes = [8, 1], strides = [1, 1]} : vector<8x8xf32> to vector<8x1xf32>
    %60 = vector.broadcast %59 : vector<8x1xf32> to vector<8x128xf32>
    %61 = arith.mulf %60, %58 : vector<8x128xf32>
    %62 = arith.addf %56, %61 : vector<8x128xf32>
    %c5_i32 = arith.constant 5 : i32
    %63 = tpu.dynamic_rotate %34 by %c5_i32 dim 1 : vector<8x256xf32>, i32 -> vector<8x256xf32>
    %64 = vector.extract_strided_slice %63 {offsets = [0, 128], sizes = [8, 128], strides = [1, 1]} : vector<8x256xf32> to vector<8x128xf32>
    %65 = vector.extract_strided_slice %2 {offsets = [0, 5], sizes = [8, 1], strides = [1, 1]} : vector<8x8xf32> to vector<8x1xf32>
    %66 = vector.broadcast %65 : vector<8x1xf32> to vector<8x128xf32>
    %67 = arith.mulf %66, %64 : vector<8x128xf32>
    %68 = arith.addf %62, %67 : vector<8x128xf32>
    %c6_i32 = arith.constant 6 : i32
    %69 = tpu.dynamic_rotate %34 by %c6_i32 dim 1 : vector<8x256xf32>, i32 -> vector<8x256xf32>
    %70 = vector.extract_strided_slice %69 {offsets = [0, 128], sizes = [8, 128], strides = [1, 1]} : vector<8x256xf32> to vector<8x128xf32>
    %71 = vector.extract_strided_slice %2 {offsets = [0, 6], sizes = [8, 1], strides = [1, 1]} : vector<8x8xf32> to vector<8x1xf32>
    %72 = vector.broadcast %71 : vector<8x1xf32> to vector<8x128xf32>
    %73 = arith.mulf %72, %70 : vector<8x128xf32>
    %74 = arith.addf %68, %73 : vector<8x128xf32>
    %c7_i32 = arith.constant 7 : i32
    %75 = tpu.dynamic_rotate %34 by %c7_i32 dim 1 : vector<8x256xf32>, i32 -> vector<8x256xf32>
    %76 = vector.extract_strided_slice %75 {offsets = [0, 128], sizes = [8, 128], strides = [1, 1]} : vector<8x256xf32> to vector<8x128xf32>
    %77 = vector.extract_strided_slice %2 {offsets = [0, 7], sizes = [8, 1], strides = [1, 1]} : vector<8x8xf32> to vector<8x1xf32>
    %78 = vector.broadcast %77 : vector<8x1xf32> to vector<8x128xf32>
    %79 = arith.mulf %78, %76 : vector<8x128xf32>
    %80 = arith.addf %74, %79 : vector<8x128xf32>
    %c0_28 = arith.constant 0 : index
    %c0_29 = arith.constant 0 : index
    %81 = vector.load %arg10[%c0_28, %c0_29] : memref<8x128xf32, #tpu.memory_space<vmem>>, vector<8x128xf32>
    tpu.vector_store %arg10[%c0_28, %c0_29], %80 {strides = array<i32>} : memref<8x128xf32, #tpu.memory_space<vmem>>, vector<8x128xf32>,
    return
  }
  func.func @transform_0(%arg0: i32) -> (i32, i32) {
    %c0_i32 = arith.constant 0 : i32
    %c0_i32_0 = arith.constant 0 : i32
    return %arg0, %c0_i32 : i32, i32
  }
  func.func @transform_1(%arg0: i32) -> (i32, i32) {
    %c0_i32 = arith.constant 0 : i32
    %c0_i32_0 = arith.constant 0 : i32
    return %arg0, %c0_i32 : i32, i32
  }
  func.func @transform_2(%arg0: i32) -> (i32, i32) {
    %c0_i32 = arith.constant 0 : i32
    %c0_i32_0 = arith.constant 0 : i32
    return %arg0, %c0_i32 : i32, i32
  }
  func.func @transform_3(%arg0: i32) -> (i32, i32) {
    %c0_i32 = arith.constant 0 : i32
    %c0_i32_0 = arith.constant 0 : i32
    %c0_i32_1 = arith.constant 0 : i32
    return %c0_i32, %c0_i32_0 : i32, i32
  }
  func.func @transform_4(%arg0: i32) -> (i32, i32) {
    %c0_i32 = arith.constant 0 : i32
    %c0_i32_0 = arith.constant 0 : i32
    %c0_i32_1 = arith.constant 0 : i32
    return %c0_i32, %c0_i32_0 : i32, i32
  }
  func.func @transform_5(%arg0: i32) -> (i32, i32) {
    %c0_i32 = arith.constant 0 : i32
    %c0_i32_0 = arith.constant 0 : i32
    %c0_i32_1 = arith.constant 0 : i32
    return %c0_i32, %c0_i32_0 : i32, i32
  }
  func.func @transform_6(%arg0: i32) -> (i32, i32) {
    %c0_i32 = arith.constant 0 : i32
    %c0_i32_0 = arith.constant 0 : i32
    %c0_i32_1 = arith.constant 0 : i32
    return %c0_i32, %c0_i32_0 : i32, i32
  }
  func.func @transform_7(%arg0: i32) -> (i32, i32) {
    %c0_i32 = arith.constant 0 : i32
    %c0_i32_0 = arith.constant 0 : i32
    %c0_i32_1 = arith.constant 0 : i32
    return %c0_i32, %c0_i32_0 : i32, i32
  }
  func.func @transform_8(%arg0: i32) -> (i32, i32) {
    %c0_i32 = arith.constant 0 : i32
    %c0_i32_0 = arith.constant 0 : i32
    %c0_i32_1 = arith.constant 0 : i32
    return %c0_i32, %c0_i32_0 : i32, i32
  }
  func.func @transform_9(%arg0: i32) -> (i32, i32) {
    %c0_i32 = arith.constant 0 : i32
    %c0_i32_0 = arith.constant 0 : i32
    return %arg0, %c0_i32 : i32, i32
  }
}

</mosaic_0001>

<bundles_post_ra>
// kernel: tpu_custom_call.1
= control target key start
LH: loop header
LB: loop body
LE: loop exit
PB: predicated region body
PF: predicated region fallthrough
CT: control target
= control target key end

     0   :  { %v806_v1 = vmov 0.0   ;;  %vm807_vm0 = vmmov 0   ;;  %s1024_s0 = inlined_call_operand.vmem [shape: bf16[8,128], index: 0, kind: input, shape index: {}]   ;;  %s1025_s1 = inlined_call_operand.vmem [shape: bf16[8,128], index: 1, kind: input, shape index: {}]   ;;  %s1026_s2 = inlined_call_operand.vmem [shape: bf16[8,128], index: 2, kind: input, shape index: {}]   ;;  %s1027_s3 = inlined_call_operand.vmem [shape: bf16[128,8], index: 3, kind: input, shape index: {}]   ;;  %s1028_s4 = inlined_call_operand.vmem [shape: bf16[128,8], index: 4, kind: input, shape index: {}]   ;;  %s1029_s5 = inlined_call_operand.vmem [shape: f32[1,8], index: 5, kind: input, shape index: {}]   ;;  %s1030_s6 = inlined_call_operand.vmem [shape: bf16[128,128], index: 6, kind: input, shape index: {}]   ;;  %s1031_s7 = inlined_call_operand.vmem [shape: f32[8,8], index: 7, kind: input, shape index: {}]   ;;  %s1032_s8 = inlined_call_operand.vmem [shape: bf16[8,128], index: 8, kind: input, shape index: {}]   ;;  %s1033_s9 = inlined_call_operand.hbm [shape: f32[8,128], index: 9, kind: output, shape index: {}]  }
   0x1   :  { %v754_v0 = vld [vmem:[%s1028_s4 + $0x38] sm:$0xff]   ;;  %677 = vmatprep.subr.bf16.mxu1 %v806_v1  ;;  %657 = vmatprep.subr.bf16.mxu0 %v806_v1  ;;  %v755_v2 = vld [vmem:[%s1028_s4 + $0x30] sm:$0xff]   ;;  %v756_v3 = vld [vmem:[%s1028_s4 + $0x28] sm:$0xff]  }
   0x2   :  { %678 = vmatpush3.bf16.msra.mxu1 %v754_v0  ;;  %693 = vmatprep.mubr.msk.bf16.mxu1 %vm807_vm0, %v806_v1  ;;  %v762_v4 = vld [vmem:[%s1027_s3 + $0x38] sm:$0xff]   ;;  %v757_v5 = vld [vmem:[%s1028_s4 + $0x20] sm:$0xff]   ;;  %v763_v6 = vld [vmem:[%s1027_s3 + $0x30] sm:$0xff]  }
   0x3   :  { %679 = vmatprep.subr.bf16.mxu1 %v806_v1  ;;  %673 = vmatprep.mubr.msk.bf16.mxu0 %vm807_vm0, %v806_v1  ;;  %v758_v7 = vld [vmem:[%s1028_s4 + $0x18] sm:$0xff]   ;;  %v764_v8 = vld [vmem:[%s1027_s3 + $0x28] sm:$0xff]   ;;  %v759_v9 = vld [vmem:[%s1028_s4 + $0x10] sm:$0xff]  }
   0x4   :  { %658 = vmatpush3.bf16.msra.mxu0 %v762_v4  ;;  %v765_v10 = vld [vmem:[%s1027_s3 + $0x20] sm:$0xff]  }
   0x5   :  { %659 = vmatprep.subr.bf16.mxu0 %v806_v1 }
   0x6   :  { %680 = vmatpush3.bf16.msra.mxu1 %v755_v2 }
   0x7   :  { %681 = vmatprep.subr.bf16.mxu1 %v806_v1 }
   0x8   :  { %660 = vmatpush3.bf16.msra.mxu0 %v763_v6 }
   0x9   :  { %661 = vmatprep.subr.bf16.mxu0 %v806_v1 }
   0xa   :  { %682 = vmatpush3.bf16.msra.mxu1 %v756_v3 }
   0xb   :  { %683 = vmatprep.subr.bf16.mxu1 %v806_v1 }
   0xc   :  { %662 = vmatpush3.bf16.msra.mxu0 %v764_v8 }
   0xd   :  { %663 = vmatprep.subr.bf16.mxu0 %v806_v1 }
   0xe   :  { %684 = vmatpush3.bf16.msra.mxu1 %v757_v5 }
   0xf   :  { %685 = vmatprep.subr.bf16.mxu1 %v806_v1 }
  0x12   :  { %686 = vmatpush3.bf16.msra.mxu1 %v758_v7 }
  0x13   :  { %687 = vmatprep.subr.bf16.mxu1 %v806_v1 }
  0x14   :  { %14 = vsyncpa [#allocation3], 0  ;;  %v760_v11 = vld [vmem:[%s1028_s4 + $0x8] sm:$0xff]   ;;  %664 = vmatpush3.bf16.msra.mxu0 %v765_v10  ;;  %v766_v12 = vld [vmem:[%s1027_s3 + $0x18] sm:$0xff]   ;;  %v808_v20 = vmov 0   ;;  %s810_s24 = smov 2  }
  0x15   :  { %665 = vmatprep.subr.bf16.mxu0 %v806_v1  ;;  %v761_v13 = vld [vmem:[%s1028_s4] sm:$0xff]   ;;  %v767_v14 = vld [vmem:[%s1027_s3 + $0x10] sm:$0xff]   ;;  %v768_v16 = vld [vmem:[%s1027_s3 + $0x8] sm:$0xff]   ;;  %746 = vset.pattern.permute.xlu0 %v808_v20  ;;  %s813_s29 = smov 5   ;;  %s814_s11 = smov 6   ;;  %v815_v24 = vmov 2  }
  0x16   :  { %688 = vmatpush3.bf16.msra.mxu1 %v759_v9  ;;  %v139_v15 = vld [vmem:[%s1025_s1] sm:$0xf]  ;;  %v770_v21 = vld [vmem:[%s1030_s6 + $0x38] sm:$0xff]   ;;  %v771_v22 = vld [vmem:[%s1030_s6 + $0x30] sm:$0xff]   ;;  %748 = vset.pattern.permute.xlu1 %v815_v24  ;;  %vm261_vm1 = vcmask 64512   ;;  %v816_v45 = vmov 1  }
  0x17   :  { %689 = vmatprep.subr.bf16.mxu1 %v806_v1  ;;  %v769_v17 = vld [vmem:[%s1027_s3] sm:$0xff]   ;;  %s809_s3 = smov 1   ;;  %v772_v23 = vld [vmem:[%s1030_s6 + $0x28] sm:$0xff]   ;;  %v774_v26 = vld [vmem:[%s1030_s6 + $0x18] sm:$0xff]   ;;  %v817_v47 = vmov 3   ;;  %v818_v48 = vmov 4  }
  0x18   :  { %666 = vmatpush3.bf16.msra.mxu0 %v766_v12  ;;  %v34_v18 = vld [vmem:[%s1026_s2] sm:$0xf]  ;;  %498 = vrot.lane.b32.xlu1 %v806_v1, %s809_s3  ;;  %s811_s2 = smov 3   ;;  %v819_v49 = vmov 5   ;;  %v820_v50 = vmov 6   ;;  %v821_v51 = vmov 7  }
  0x19   :  { %667 = vmatprep.subr.bf16.mxu0 %v806_v1  ;;  %v260_v19 = vld [vmem:[%s1031_s7] sm:$0xff]  ;;  %s812_s7 = smov 4   ;;  %v775_v52 = vld [vmem:[%s1030_s6 + $0x10] sm:$0xff]   ;;  %v776_v53 = vld [vmem:[%s1030_s6 + $0x8] sm:$0xff]   ;;  %vm447_vm2 = vcmask 1043456  }
  0x1a   :  { %690 = vmatpush3.bf16.msra.mxu1 %v760_v11  ;;  %v773_v25 = vld [vmem:[%s1030_s6 + $0x20] sm:$0xff]  }
  0x1b   :  { %691 = vmatprep.subr.bf16.mxu1 %v806_v1  ;;  %v607_v27 = vld [vmem:[%s1029_s5] ss:$0 sm:$0xff] }
  0x1c   :  { %668 = vmatpush3.bf16.msra.mxu0 %v767_v14  ;;  %512 = vrot.lane.b32.xlu1 %v806_v1, %s810_s24  ;;  %v777_v54 = vld [vmem:[%s1030_s6] sm:$0xff]   ;;  %s823_s6 = smov [#allocation2]  }
  0x1d   :  { %669 = vmatprep.subr.bf16.mxu0 %v806_v1  ;;  %v338_v55 = vld [vmem:[%s1024_s0] sm:$0xf]  ;;  %s822_s0 = smov 7  }
  0x1e   :  { %692 = vmatpush3.bf16.msra.mxu1 %v761_v13  ;;  %v443_v56 = vld [vmem:[%s1032_s8] sm:$0xf]  ;;  %s591_s8 = sshll.u32 %s823_s6, 4  ;;  %s592_s8 = int_to_ptr.vmem [resolvable:$true] %s591_s8 }
  0x1f   :  { %702 = vmatprep.subr.bf16.mxu1 %v806_v1  ;;  %v449_v57 = vsel %vm447_vm2, %v443_v56, 0  ;;  %p789_p1 = scmp.lt.s32.totalorder %s592_s8, %s592_s8 }
  0x20   :  { %670 = vmatpush3.bf16.msra.mxu0 %v768_v16  ;;  %524 = vrot.lane.b32.xlu1 %v806_v1, %s811_s2 }
  0x21   :  { %694 = vmatmul.mubr.bf16.vlgmr.msra.gmra.mxu1 %v139_v15  ;;  %671 = vmatprep.subr.bf16.mxu0 %v806_v1 }
  0x22   :  { %718 = vmatprep.mubr.msk.bf16.mxu1 %vm807_vm0, %v806_v1  ;;  %703 = vmatpush3.bf16.msra.mxu1 %v770_v21 }
  0x23   :  { %704 = vmatprep.subr.bf16.mxu1 %v806_v1 }
  0x24   :  { %672 = vmatpush3.bf16.msra.mxu0 %v769_v17  ;;  %536 = vrot.lane.b32.xlu1 %v806_v1, %s812_s7 }
  0x25   :  { %697 = vmatprep.subr.mxu0 %v806_v1 }
  0x26   :  { %705 = vmatpush3.bf16.msra.mxu1 %v771_v22 }
  0x27   :  { %674 = vmatmul.mubr.bf16.vlgmr.msra.gmra.mxu0 %v34_v18  ;;  %706 = vmatprep.subr.bf16.mxu1 %v806_v1  ;;  %v502_v18 = vlaneseq }
  0x28   :  { %699 = vmatprep.mubr.msk.f32.mxu0 %vm807_vm0, %v806_v1  ;;  %698 = vmatpush3.msra.mxu0 %v260_v19 }
  0x29   :  { %722 = vmatprep.subr.bf16.mxu0 %v806_v1  ;;  %548 = vrot.lane.b32.xlu1 %v806_v1, %s813_s29  ;;  %v503_v21 = vand.u32 127, %v502_v18 }
  0x2a   :  { %707 = vmatpush3.bf16.msra.mxu1 %v772_v23 }
  0x2b   :  { %708 = vmatprep.subr.bf16.mxu1 %v806_v1  ;;  %vm504_vm3 = vcmp.lt.s32.totalorder %v503_v21, 1  ;;  %vm516_vm4 = vcmp.lt.s32.totalorder %v503_v21, 2  ;;  %vm528_vm5 = vcmp.lt.s32.totalorder %v503_v21, 3  ;;  %vm540_vm6 = vcmp.lt.s32.totalorder %v503_v21, 4 }
  0x2c   :  { %vm552_vm7 = vcmp.lt.s32.totalorder %v503_v21, 5  ;;  %vm564_vm8 = vcmp.lt.s32.totalorder %v503_v21, 6  ;;  %vm576_vm9 = vcmp.lt.s32.totalorder %v503_v21, 7 }
  0x2d   :  { %560 = vrot.lane.b32.xlu1 %v806_v1, %s814_s11 }
  0x2e   :  { %709 = vmatpush3.bf16.msra.mxu1 %v773_v25 }
  0x2f   :  { %710 = vmatprep.subr.bf16.mxu1 %v806_v1 }
  0x32   :  { %711 = vmatpush3.bf16.msra.mxu1 %v774_v26 }
  0x33   :  { %712 = vmatprep.subr.bf16.mxu1 %v806_v1 }
  0x36   :  { %713 = vmatpush3.bf16.msra.mxu1 %v775_v52 }
  0x37   :  { %714 = vmatprep.subr.bf16.mxu1 %v806_v1 }
  0x3a   :  { %715 = vmatpush3.bf16.msra.mxu1 %v776_v53 }
  0x3b   :  { %716 = vmatprep.subr.bf16.mxu1 %v806_v1 }
  0x3e   :  { %717 = vmatpush3.bf16.msra.mxu1 %v777_v54 }
  0x41   :  { %719 = vmatmul.mubr.bf16.vlgmr.msra.gmra.mxu1 %v338_v55 }
  0x8a   :  { %v499_v9 = vpop.permute.xlu1 %498 }
  0xe1   :  { %v245_v28 = vpop.f32.mrf.mxu1 }
  0xe2   :  { %v246_v29 = vadd.f32 %v607_v27, %v245_v28 }
  0xe3   :  { %v695_v30 = vpop.f32.mrf.mxu1 }
  0xe4   :  { %v251_v31 = vmul.f32 0.5, %v246_v29 }
  0xe5   :  { %v248_v32 = vpop.f32.mrf.mxu1 }
  0xe6   :  { %778 = vtanh.f32 %v251_v31 }
  0xe7   :  { %v696_v33 = vpop.f32.mrf.mxu1  ;;  %v133_v42 = vpop.f32.mrf.mxu0 }
  0xe8   :  { %494 = vperm.xlu0 %746, %v133_v42   ;;  %519 = vperm.xlu1 %748, %v133_v42  }
  0xe9   :  { %v675_v43 = vpop.f32.mrf.mxu0 }
  0xeb   :  { %v136_v44 = vpop.f32.mrf.mxu0 }
  0xec   :  { %747 = vset.pattern.permute.xlu0 %v816_v45 }
  0xed   :  { %507 = vperm.xlu0 %747, %v133_v42   ;;  %v676_v46 = vpop.f32.mrf.mxu0 }
  0xf1   :  { %749 = vset.pattern.permute.xlu0 %v817_v47 }
  0xf2   :  { %531 = vperm.xlu0 %749, %v133_v42  }
  0xf3   :  { %v779_v34 = vpop.eup %778 }
  0xf4   :  { %v253_v35 = vmul.f32 0.5, %v779_v34 }
  0xf6   :  { %v254_v36 = vadd.f32 0.5, %v253_v35  ;;  %750 = vset.pattern.permute.xlu0 %v818_v48 }
  0xf7   :  { %543 = vperm.xlu0 %750, %v133_v42  }
  0xf8   :  { %v255_v37 = vmul.f32 0.9702, %v254_v36 }
  0xfa   :  { %v256_v38 = vadd.f32 0.02, %v255_v37 }
  0xfb   :  { %751 = vset.pattern.permute.xlu0 %v819_v49 }
  0xfc   :  { %v257_v39 = vadd.f32 1e-12, %v256_v38  ;;  %555 = vperm.xlu0 %751, %v133_v42  }
  0xfe   :  { %780 = vlog2.f32 %v257_v39 }
 0x100   :  { %752 = vset.pattern.permute.xlu0 %v820_v50 }
 0x101   :  { %567 = vperm.xlu0 %752, %v133_v42   ;;  %v437_v63 = vpop.f32.mrf.mxu1 }
 0x103   :  { %v720_v0 = vpop.f32.mrf.mxu1 }
 0x105   :  { %753 = vset.pattern.permute.xlu0 %v821_v51  ;;  %v440_v2 = vpop.f32.mrf.mxu1 }
 0x106   :  { %579 = vperm.xlu0 %753, %v133_v42  }
 0x107   :  { %v721_v3 = vpop.f32.mrf.mxu1 }
 0x10a   :  { %572 = vrot.lane.b32.xlu0 %v806_v1, %s822_s0 }
 0x10b   :  { %v781_v40 = vpop.eup %780 }
 0x10c   :  { %v259_v41 = vmul.f32 0.6931472, %v781_v40 }
 0x10e   :  { %700 = vmatmul.mubr.msk.f32.vlgmr.msra.gmra.mxu0 %vm261_vm1, %v259_v41 }
 0x10f   :  { %724 = vmatprep.mubr.msk.bf16.mxu0 %vm807_vm0, %v806_v1  ;;  %723 = vmatpush3.bf16.msra.mxu0 %v449_v57  ;;  %v513_v1 = vpop.permute.xlu1 %512 }
 0x113   :  { %v525_v10 = vpop.permute.xlu1 %524 }
 0x117   :  { %v537_v11 = vpop.permute.xlu1 %536 }
 0x11b   :  { %v549_v13 = vpop.permute.xlu1 %548 }
 0x11f   :  { %v561_v15 = vpop.permute.xlu1 %560 }
 0x163   :  { %v495_v12 = vpop.permute.xlu0 %494  ;;  %v520_v17 = vpop.permute.xlu1 %519 }
 0x168   :  { %v508_v14 = vpop.permute.xlu0 %507 }
 0x16d   :  { %v532_v16 = vpop.permute.xlu0 %531 }
 0x172   :  { %v544_v19 = vpop.permute.xlu0 %543 }
 0x177   :  { %v556_v23 = vpop.permute.xlu0 %555 }
 0x17c   :  { %v568_v27 = vpop.permute.xlu0 %567 }
 0x181   :  { %v580_v38 = vpop.permute.xlu0 %579 }
 0x185   :  { %v573_v47 = vpop.permute.xlu0 %572 }
 0x1ce   :  { %v331_v58 = vpop.f32.mrf.mxu0 }
 0x1cf   :  { %v335_v59 = vmul.f32 1.442695, %v331_v58 }
 0x1d0   :  { %v701_v60 = vpop.f32.mrf.mxu0 }
 0x1d1   :  { %782 = vpow2.f32 %v335_v59 }
 0x1de   :  { %v783_v61 = vpop.eup %782 }
 0x1df   :  { %v337_v62 = vpack.c.bf16 %v783_v61, %v783_v61 }
 0x1e1   :  { %725 = vmatmul.mubr.msk.bf16.vlgmr.msra.gmra.mxu0 %vm261_vm1, %v337_v62 }
 0x2a1   :  { %v485_v4 = vpop.f32.mrf.mxu0 }
 0x2a2   :  { %v491_v5 = vmul.f32 %v485_v4, %v437_v63 }
 0x2a3   :  { %v726_v6 = vpop.f32.mrf.mxu0 }
 0x2a4   :  { %500 = vrot.lane.b32.xlu1 %v491_v5, %s809_s3  ;;  %v497_v31 = vmul.f32 %v495_v12, %v491_v5  ;;  %s784_s3 = scalar_lea.vmem %s592_s8, 128 }
 0x2a5   :  { %v488_v7 = vpop.f32.mrf.mxu0  ;;  %p785_p0 = scmp.ne.s32.totalorder %s592_s8, %s784_s3  ;;  %p790_p2 = scmp.lt.s32.totalorder %s784_s3, %s784_s3 }
 0x2a7   :  { %v727_v8 = vpop.f32.mrf.mxu0  ;;  %p791_p3 = por %p790_p2, %p789_p1 }
 0x2a8   :  { %514 = vrot.lane.b32.xlu1 %v491_v5, %s810_s24 }
 0x2a9   :  { %p792_p4 = pnand %p791_p3, %p785_p0 }
 0x2ac   :  { %526 = vrot.lane.b32.xlu1 %v491_v5, %s811_s2 }
 0x2b0   :  { %538 = vrot.lane.b32.xlu1 %v491_v5, %s812_s7 }
 0x2b4   :  { %550 = vrot.lane.b32.xlu1 %v491_v5, %s813_s29 }
 0x2b8   :  { %562 = vrot.lane.b32.xlu1 %v491_v5, %s814_s11 }
 0x2bc   :  { %574 = vrot.lane.b32.xlu1 %v491_v5, %s822_s0 }
 0x316   :  { %v501_v20 = vpop.permute.xlu1 %500 }
 0x317   :  { %v505_v25 = vsel %vm504_vm3, %v499_v9, %v501_v20 }
 0x318   :  { %v510_v28 = vmul.f32 %v508_v14, %v505_v25 }
 0x31a   :  { %v515_v22 = vpop.permute.xlu1 %514  ;;  %v511_v34 = vadd.f32 %v510_v28, %v497_v31 }
 0x31b   :  { %v517_v26 = vsel %vm516_vm4, %v513_v1, %v515_v22 }
 0x31c   :  { %v522_v32 = vmul.f32 %v520_v17, %v517_v26 }
 0x31e   :  { %v527_v24 = vpop.permute.xlu1 %526  ;;  %v523_v39 = vadd.f32 %v522_v32, %v511_v34 }
 0x31f   :  { %v529_v30 = vsel %vm528_vm5, %v525_v10, %v527_v24 }
 0x320   :  { %v534_v35 = vmul.f32 %v532_v16, %v529_v30 }
 0x322   :  { %v539_v29 = vpop.permute.xlu1 %538  ;;  %v535_v41 = vadd.f32 %v534_v35, %v523_v39 }
 0x323   :  { %v541_v33 = vsel %vm540_vm6, %v537_v11, %v539_v29 }
 0x324   :  { %v546_v40 = vmul.f32 %v544_v19, %v541_v33 }
 0x326   :  { %v551_v36 = vpop.permute.xlu1 %550  ;;  %v547_v45 = vadd.f32 %v546_v40, %v535_v41 }
 0x327   :  { %v553_v37 = vsel %vm552_vm7, %v549_v13, %v551_v36 }
 0x328   :  { %v558_v42 = vmul.f32 %v556_v23, %v553_v37 }
 0x32a   :  { %v563_v43 = vpop.permute.xlu1 %562  ;;  %v559_v48 = vadd.f32 %v558_v42, %v547_v45 }
 0x32b   :  { %v565_v44 = vsel %vm564_vm8, %v561_v15, %v563_v43 }
 0x32c   :  { %v570_v46 = vmul.f32 %v568_v27, %v565_v44 }
 0x32e   :  { %v575_v49 = vpop.permute.xlu1 %574  ;;  %v571_v52 = vadd.f32 %v570_v46, %v559_v48 }
 0x32f   :  { %v577_v50 = vsel %vm576_vm9, %v573_v47, %v575_v49 }
 0x330   :  { %v582_v51 = vmul.f32 %v580_v38, %v577_v50 }
 0x332   :  { %v583_v53 = vadd.f32 %v582_v51, %v571_v52 }
 0x334   :  { %584 = vst [vmem:[#allocation2] sm:$0xff] %v583_v53 }
 0x335   :  { %795 = shalt.err (!%p792_p4)
}
 0x336   :  { %594 = dma.vmem_to_hbm [thread:$0]  %s592_s8, 128, %s1033_s9, [#allocation3]  }
 0x337   :  { %804 = dma.done.wait [#allocation3], 128  }
 0x338   :  { %805 = vsyncadd [#allocation3], 4294967168 }
 0x339   :  { %598 = vsyncpa [#allocation3], 1 }

// kernel: tpu_custom_call.1
= control target key start
LH: loop header
LB: loop body
LE: loop exit
PB: predicated region body
PF: predicated region fallthrough
CT: control target
= control target key end

     0   :  { %v806_v1 = vmov 0.0   ;;  %vm807_vm0 = vmmov 0   ;;  %s1024_s0 = inlined_call_operand.vmem [shape: bf16[8,128], index: 0, kind: input, shape index: {}]   ;;  %s1025_s1 = inlined_call_operand.vmem [shape: bf16[8,128], index: 1, kind: input, shape index: {}]   ;;  %s1026_s2 = inlined_call_operand.vmem [shape: bf16[8,128], index: 2, kind: input, shape index: {}]   ;;  %s1027_s3 = inlined_call_operand.vmem [shape: bf16[128,8], index: 3, kind: input, shape index: {}]   ;;  %s1028_s4 = inlined_call_operand.vmem [shape: bf16[128,8], index: 4, kind: input, shape index: {}]   ;;  %s1029_s5 = inlined_call_operand.vmem [shape: f32[1,8], index: 5, kind: input, shape index: {}]   ;;  %s1030_s6 = inlined_call_operand.vmem [shape: bf16[128,128], index: 6, kind: input, shape index: {}]   ;;  %s1031_s7 = inlined_call_operand.vmem [shape: f32[8,8], index: 7, kind: input, shape index: {}]   ;;  %s1032_s8 = inlined_call_operand.vmem [shape: bf16[8,128], index: 8, kind: input, shape index: {}]   ;;  %s1033_s9 = inlined_call_operand.hbm [shape: f32[8,128], index: 9, kind: output, shape index: {}]  }
   0x1   :  { %v754_v0 = vld [vmem:[%s1028_s4 + $0x38] sm:$0xff]   ;;  %677 = vmatprep.subr.bf16.mxu1 %v806_v1  ;;  %657 = vmatprep.subr.bf16.mxu0 %v806_v1  ;;  %v755_v2 = vld [vmem:[%s1028_s4 + $0x30] sm:$0xff]   ;;  %v756_v3 = vld [vmem:[%s1028_s4 + $0x28] sm:$0xff]  }
   0x2   :  { %678 = vmatpush3.bf16.msra.mxu1 %v754_v0  ;;  %693 = vmatprep.mubr.msk.bf16.mxu1 %vm807_vm0, %v806_v1  ;;  %v762_v4 = vld [vmem:[%s1027_s3 + $0x38] sm:$0xff]   ;;  %v757_v5 = vld [vmem:[%s1028_s4 + $0x20] sm:$0xff]   ;;  %v763_v6 = vld [vmem:[%s1027_s3 + $0x30] sm:$0xff]  }
   0x3   :  { %679 = vmatprep.subr.bf16.mxu1 %v806_v1  ;;  %673 = vmatprep.mubr.msk.bf16.mxu0 %vm807_vm0, %v806_v1  ;;  %v758_v7 = vld [vmem:[%s1028_s4 + $0x18] sm:$0xff]   ;;  %v764_v8 = vld [vmem:[%s1027_s3 + $0x28] sm:$0xff]   ;;  %v759_v9 = vld [vmem:[%s1028_s4 + $0x10] sm:$0xff]  }
   0x4   :  { %658 = vmatpush3.bf16.msra.mxu0 %v762_v4  ;;  %v765_v10 = vld [vmem:[%s1027_s3 + $0x20] sm:$0xff]  }
   0x5   :  { %659 = vmatprep.subr.bf16.mxu0 %v806_v1 }
   0x6   :  { %680 = vmatpush3.bf16.msra.mxu1 %v755_v2 }
   0x7   :  { %681 = vmatprep.subr.bf16.mxu1 %v806_v1 }
   0x8   :  { %660 = vmatpush3.bf16.msra.mxu0 %v763_v6 }
   0x9   :  { %661 = vmatprep.subr.bf16.mxu0 %v806_v1 }
   0xa   :  { %682 = vmatpush3.bf16.msra.mxu1 %v756_v3 }
   0xb   :  { %683 = vmatprep.subr.bf16.mxu1 %v806_v1 }
   0xc   :  { %662 = vmatpush3.bf16.msra.mxu0 %v764_v8 }
   0xd   :  { %663 = vmatprep.subr.bf16.mxu0 %v806_v1 }
   0xe   :  { %684 = vmatpush3.bf16.msra.mxu1 %v757_v5 }
   0xf   :  { %685 = vmatprep.subr.bf16.mxu1 %v806_v1 }
  0x12   :  { %686 = vmatpush3.bf16.msra.mxu1 %v758_v7 }
  0x13   :  { %687 = vmatprep.subr.bf16.mxu1 %v806_v1 }
  0x14   :  { %14 = vsyncpa [#allocation3], 0  ;;  %v760_v11 = vld [vmem:[%s1028_s4 + $0x8] sm:$0xff]   ;;  %664 = vmatpush3.bf16.msra.mxu0 %v765_v10  ;;  %v766_v12 = vld [vmem:[%s1027_s3 + $0x18] sm:$0xff]   ;;  %v808_v20 = vmov 0   ;;  %s810_s24 = smov 2  }
  0x15   :  { %665 = vmatprep.subr.bf16.mxu0 %v806_v1  ;;  %v761_v13 = vld [vmem:[%s1028_s4] sm:$0xff]   ;;  %v767_v14 = vld [vmem:[%s1027_s3 + $0x10] sm:$0xff]   ;;  %v768_v16 = vld [vmem:[%s1027_s3 + $0x8] sm:$0xff]   ;;  %746 = vset.pattern.permute.xlu0 %v808_v20  ;;  %s813_s29 = smov 5   ;;  %s814_s11 = smov 6   ;;  %v815_v24 = vmov 2  }
  0x16   :  { %688 = vmatpush3.bf16.msra.mxu1 %v759_v9  ;;  %v139_v15 = vld [vmem:[%s1025_s1] sm:$0xf]  ;;  %v770_v21 = vld [vmem:[%s1030_s6 + $0x38] sm:$0xff]   ;;  %v771_v22 = vld [vmem:[%s1030_s6 + $0x30] sm:$0xff]   ;;  %748 = vset.pattern.permute.xlu1 %v815_v24  ;;  %vm261_vm1 = vcmask 64512   ;;  %v816_v45 = vmov 1  }
  0x17   :  { %689 = vmatprep.subr.bf16.mxu1 %v806_v1  ;;  %v769_v17 = vld [vmem:[%s1027_s3] sm:$0xff]   ;;  %s809_s3 = smov 1   ;;  %v772_v23 = vld [vmem:[%s1030_s6 + $0x28] sm:$0xff]   ;;  %v774_v26 = vld [vmem:[%s1030_s6 + $0x18] sm:$0xff]   ;;  %v817_v47 = vmov 3   ;;  %v818_v48 = vmov 4  }
  0x18   :  { %666 = vmatpush3.bf16.msra.mxu0 %v766_v12  ;;  %v34_v18 = vld [vmem:[%s1026_s2] sm:$0xf]  ;;  %498 = vrot.lane.b32.xlu1 %v806_v1, %s809_s3  ;;  %s811_s2 = smov 3   ;;  %v819_v49 = vmov 5   ;;  %v820_v50 = vmov 6   ;;  %v821_v51 = vmov 7  }
  0x19   :  { %667 = vmatprep.subr.bf16.mxu0 %v806_v1  ;;  %v260_v19 = vld [vmem:[%s1031_s7] sm:$0xff]  ;;  %s812_s7 = smov 4   ;;  %v775_v52 = vld [vmem:[%s1030_s6 + $0x10] sm:$0xff]   ;;  %v776_v53 = vld [vmem:[%s1030_s6 + $0x8] sm:$0xff]   ;;  %vm447_vm2 = vcmask 1043456  }
  0x1a   :  { %690 = vmatpush3.bf16.msra.mxu1 %v760_v11  ;;  %v773_v25 = vld [vmem:[%s1030_s6 + $0x20] sm:$0xff]  }
  0x1b   :  { %691 = vmatprep.subr.bf16.mxu1 %v806_v1  ;;  %v607_v27 = vld [vmem:[%s1029_s5] ss:$0 sm:$0xff] }
  0x1c   :  { %668 = vmatpush3.bf16.msra.mxu0 %v767_v14  ;;  %512 = vrot.lane.b32.xlu1 %v806_v1, %s810_s24  ;;  %v777_v54 = vld [vmem:[%s1030_s6] sm:$0xff]   ;;  %s823_s6 = smov [#allocation2]  }
  0x1d   :  { %669 = vmatprep.subr.bf16.mxu0 %v806_v1  ;;  %v338_v55 = vld [vmem:[%s1024_s0] sm:$0xf]  ;;  %s822_s0 = smov 7  }
  0x1e   :  { %692 = vmatpush3.bf16.msra.mxu1 %v761_v13  ;;  %v443_v56 = vld [vmem:[%s1032_s8] sm:$0xf]  ;;  %s591_s8 = sshll.u32 %s823_s6, 4  ;;  %s592_s8 = int_to_ptr.vmem [resolvable:$true] %s591_s8 }
  0x1f   :  { %702 = vmatprep.subr.bf16.mxu1 %v806_v1  ;;  %v449_v57 = vsel %vm447_vm2, %v443_v56, 0  ;;  %p789_p1 = scmp.lt.s32.totalorder %s592_s8, %s592_s8 }
  0x20   :  { %670 = vmatpush3.bf16.msra.mxu0 %v768_v16  ;;  %524 = vrot.lane.b32.xlu1 %v806_v1, %s811_s2 }
  0x21   :  { %694 = vmatmul.mubr.bf16.vlgmr.msra.gmra.mxu1 %v139_v15  ;;  %671 = vmatprep.subr.bf16.mxu0 %v806_v1 }
  0x22   :  { %718 = vmatprep.mubr.msk.bf16.mxu1 %vm807_vm0, %v806_v1  ;;  %703 = vmatpush3.bf16.msra.mxu1 %v770_v21 }
  0x23   :  { %704 = vmatprep.subr.bf16.mxu1 %v806_v1 }
  0x24   :  { %672 = vmatpush3.bf16.msra.mxu0 %v769_v17  ;;  %536 = vrot.lane.b32.xlu1 %v806_v1, %s812_s7 }
  0x25   :  { %697 = vmatprep.subr.mxu0 %v806_v1 }
  0x26   :  { %705 = vmatpush3.bf16.msra.mxu1 %v771_v22 }
  0x27   :  { %674 = vmatmul.mubr.bf16.vlgmr.msra.gmra.mxu0 %v34_v18  ;;  %706 = vmatprep.subr.bf16.mxu1 %v806_v1  ;;  %v502_v18 = vlaneseq }
  0x28   :  { %699 = vmatprep.mubr.msk.f32.mxu0 %vm807_vm0, %v806_v1  ;;  %698 = vmatpush3.msra.mxu0 %v260_v19 }
  0x29   :  { %722 = vmatprep.subr.bf16.mxu0 %v806_v1  ;;  %548 = vrot.lane.b32.xlu1 %v806_v1, %s813_s29  ;;  %v503_v21 = vand.u32 127, %v502_v18 }
  0x2a   :  { %707 = vmatpush3.bf16.msra.mxu1 %v772_v23 }
  0x2b   :  { %708 = vmatprep.subr.bf16.mxu1 %v806_v1  ;;  %vm504_vm3 = vcmp.lt.s32.totalorder %v503_v21, 1  ;;  %vm516_vm4 = vcmp.lt.s32.totalorder %v503_v21, 2  ;;  %vm528_vm5 = vcmp.lt.s32.totalorder %v503_v21, 3  ;;  %vm540_vm6 = vcmp.lt.s32.totalorder %v503_v21, 4 }
  0x2c   :  { %vm552_vm7 = vcmp.lt.s32.totalorder %v503_v21, 5  ;;  %vm564_vm8 = vcmp.lt.s32.totalorder %v503_v21, 6  ;;  %vm576_vm9 = vcmp.lt.s32.totalorder %v503_v21, 7 }
  0x2d   :  { %560 = vrot.lane.b32.xlu1 %v806_v1, %s814_s11 }
  0x2e   :  { %709 = vmatpush3.bf16.msra.mxu1 %v773_v25 }
  0x2f   :  { %710 = vmatprep.subr.bf16.mxu1 %v806_v1 }
  0x32   :  { %711 = vmatpush3.bf16.msra.mxu1 %v774_v26 }
  0x33   :  { %712 = vmatprep.subr.bf16.mxu1 %v806_v1 }
  0x36   :  { %713 = vmatpush3.bf16.msra.mxu1 %v775_v52 }
  0x37   :  { %714 = vmatprep.subr.bf16.mxu1 %v806_v1 }
  0x3a   :  { %715 = vmatpush3.bf16.msra.mxu1 %v776_v53 }
  0x3b   :  { %716 = vmatprep.subr.bf16.mxu1 %v806_v1 }
  0x3e   :  { %717 = vmatpush3.bf16.msra.mxu1 %v777_v54 }
  0x41   :  { %719 = vmatmul.mubr.bf16.vlgmr.msra.gmra.mxu1 %v338_v55 }
  0x8a   :  { %v499_v9 = vpop.permute.xlu1 %498 }
  0xe1   :  { %v245_v28 = vpop.f32.mrf.mxu1 }
  0xe2   :  { %v246_v29 = vadd.f32 %v607_v27, %v245_v28 }
  0xe3   :  { %v695_v30 = vpop.f32.mrf.mxu1 }
  0xe4   :  { %v251_v31 = vmul.f32 0.5, %v246_v29 }
  0xe5   :  { %v248_v32 = vpop.f32.mrf.mxu1 }
  0xe6   :  { %778 = vtanh.f32 %v251_v31 }
  0xe7   :  { %v696_v33 = vpop.f32.mrf.mxu1  ;;  %v133_v42 = vpop.f32.mrf.mxu0 }
  0xe8   :  { %494 = vperm.xlu0 %746, %v133_v42   ;;  %519 = vperm.xlu1 %748, %v133_v42  }
  0xe9   :  { %v675_v43 = vpop.f32.mrf.mxu0 }
  0xeb   :  { %v136_v44 = vpop.f32.mrf.mxu0 }
  0xec   :  { %747 = vset.pattern.permute.xlu0 %v816_v45 }
  0xed   :  { %507 = vperm.xlu0 %747, %v133_v42   ;;  %v676_v46 = vpop.f32.mrf.mxu0 }
  0xf1   :  { %749 = vset.pattern.permute.xlu0 %v817_v47 }
  0xf2   :  { %531 = vperm.xlu0 %749, %v133_v42  }
  0xf3   :  { %v779_v34 = vpop.eup %778 }
  0xf4   :  { %v253_v35 = vmul.f32 0.5, %v779_v34 }
  0xf6   :  { %v254_v36 = vadd.f32 0.5, %v253_v35  ;;  %750 = vset.pattern.permute.xlu0 %v818_v48 }
  0xf7   :  { %543 = vperm.xlu0 %750, %v133_v42  }
  0xf8   :  { %v255_v37 = vmul.f32 0.9702, %v254_v36 }
  0xfa   :  { %v256_v38 = vadd.f32 0.02, %v255_v37 }
  0xfb   :  { %751 = vset.pattern.permute.xlu0 %v819_v49 }
  0xfc   :  { %v257_v39 = vadd.f32 1e-12, %v256_v38  ;;  %555 = vperm.xlu0 %751, %v133_v42  }
  0xfe   :  { %780 = vlog2.f32 %v257_v39 }
 0x100   :  { %752 = vset.pattern.permute.xlu0 %v820_v50 }
 0x101   :  { %567 = vperm.xlu0 %752, %v133_v42   ;;  %v437_v63 = vpop.f32.mrf.mxu1 }
 0x103   :  { %v720_v0 = vpop.f32.mrf.mxu1 }
 0x105   :  { %753 = vset.pattern.permute.xlu0 %v821_v51  ;;  %v440_v2 = vpop.f32.mrf.mxu1 }
 0x106   :  { %579 = vperm.xlu0 %753, %v133_v42  }
 0x107   :  { %v721_v3 = vpop.f32.mrf.mxu1 }
 0x10a   :  { %572 = vrot.lane.b32.xlu0 %v806_v1, %s822_s0 }
 0x10b   :  { %v781_v40 = vpop.eup %780 }
 0x10c   :  { %v259_v41 = vmul.f32 0.6931472, %v781_v40 }
 0x10e   :  { %700 = vmatmul.mubr.msk.f32.vlgmr.msra.gmra.mxu0 %vm261_vm1, %v259_v41 }
 0x10f   :  { %724 = vmatprep.mubr.msk.bf16.mxu0 %vm807_vm0, %v806_v1  ;;  %723 = vmatpush3.bf16.msra.mxu0 %v449_v57  ;;  %v513_v1 = vpop.permute.xlu1 %512 }
 0x113   :  { %v525_v10 = vpop.permute.xlu1 %524 }
 0x117   :  { %v537_v11 = vpop.permute.xlu1 %536 }
 0x11b   :  { %v549_v13 = vpop.permute.xlu1 %548 }
 0x11f   :  { %v561_v15 = vpop.permute.xlu1 %560 }
 0x163   :  { %v495_v12 = vpop.permute.xlu0 %494  ;;  %v520_v17 = vpop.permute.xlu1 %519 }
 0x168   :  { %v508_v14 = vpop.permute.xlu0 %507 }
 0x16d   :  { %v532_v16 = vpop.permute.xlu0 %531 }
 0x172   :  { %v544_v19 = vpop.permute.xlu0 %543 }
 0x177   :  { %v556_v23 = vpop.permute.xlu0 %555 }
 0x17c   :  { %v568_v27 = vpop.permute.xlu0 %567 }
 0x181   :  { %v580_v38 = vpop.permute.xlu0 %579 }
 0x185   :  { %v573_v47 = vpop.permute.xlu0 %572 }
 0x1ce   :  { %v331_v58 = vpop.f32.mrf.mxu0 }
 0x1cf   :  { %v335_v59 = vmul.f32 1.442695, %v331_v58 }
 0x1d0   :  { %v701_v60 = vpop.f32.mrf.mxu0 }
 0x1d1   :  { %782 = vpow2.f32 %v335_v59 }
 0x1de   :  { %v783_v61 = vpop.eup %782 }
 0x1df   :  { %v337_v62 = vpack.c.bf16 %v783_v61, %v783_v61 }
 0x1e1   :  { %725 = vmatmul.mubr.msk.bf16.vlgmr.msra.gmra.mxu0 %vm261_vm1, %v337_v62 }
 0x2a1   :  { %v485_v4 = vpop.f32.mrf.mxu0 }
 0x2a2   :  { %v491_v5 = vmul.f32 %v485_v4, %v437_v63 }
 0x2a3   :  { %v726_v6 = vpop.f32.mrf.mxu0 }
 0x2a4   :  { %500 = vrot.lane.b32.xlu1 %v491_v5, %s809_s3  ;;  %v497_v31 = vmul.f32 %v495_v12, %v491_v5  ;;  %s784_s3 = scalar_lea.vmem %s592_s8, 128 }
 0x2a5   :  { %v488_v7 = vpop.f32.mrf.mxu0  ;;  %p785_p0 = scmp.ne.s32.totalorder %s592_s8, %s784_s3  ;;  %p790_p2 = scmp.lt.s32.totalorder %s784_s3, %s784_s3 }
 0x2a7   :  { %v727_v8 = vpop.f32.mrf.mxu0  ;;  %p791_p3 = por %p790_p2, %p789_p1 }
 0x2a8   :  { %514 = vrot.lane.b32.xlu1 %v491_v5, %s810_s24 }
 0x2a9   :  { %p792_p4 = pnand %p791_p3, %p785_p0 }
 0x2ac   :  { %526 = vrot.lane.b32.xlu1 %v491_v5, %s811_s2 }
 0x2b0   :  { %538 = vrot.lane.b32.xlu1 %v491_v5, %s812_s7 }
 0x2b4   :  { %550 = vrot.lane.b32.xlu1 %v491_v5, %s813_s29 }
 0x2b8   :  { %562 = vrot.lane.b32.xlu1 %v491_v5, %s814_s11 }
 0x2bc   :  { %574 = vrot.lane.b32.xlu1 %v491_v5, %s822_s0 }
 0x316   :  { %v501_v20 = vpop.permute.xlu1 %500 }
 0x317   :  { %v505_v25 = vsel %vm504_vm3, %v499_v9, %v501_v20 }
 0x318   :  { %v510_v28 = vmul.f32 %v508_v14, %v505_v25 }
 0x31a   :  { %v515_v22 = vpop.permute.xlu1 %514  ;;  %v511_v34 = vadd.f32 %v510_v28, %v497_v31 }
 0x31b   :  { %v517_v26 = vsel %vm516_vm4, %v513_v1, %v515_v22 }
 0x31c   :  { %v522_v32 = vmul.f32 %v520_v17, %v517_v26 }
 0x31e   :  { %v527_v24 = vpop.permute.xlu1 %526  ;;  %v523_v39 = vadd.f32 %v522_v32, %v511_v34 }
 0x31f   :  { %v529_v30 = vsel %vm528_vm5, %v525_v10, %v527_v24 }
 0x320   :  { %v534_v35 = vmul.f32 %v532_v16, %v529_v30 }
 0x322   :  { %v539_v29 = vpop.permute.xlu1 %538  ;;  %v535_v41 = vadd.f32 %v534_v35, %v523_v39 }
 0x323   :  { %v541_v33 = vsel %vm540_vm6, %v537_v11, %v539_v29 }
 0x324   :  { %v546_v40 = vmul.f32 %v544_v19, %v541_v33 }
 0x326   :  { %v551_v36 = vpop.permute.xlu1 %550  ;;  %v547_v45 = vadd.f32 %v546_v40, %v535_v41 }
 0x327   :  { %v553_v37 = vsel %vm552_vm7, %v549_v13, %v551_v36 }
 0x328   :  { %v558_v42 = vmul.f32 %v556_v23, %v553_v37 }
 0x32a   :  { %v563_v43 = vpop.permute.xlu1 %562  ;;  %v559_v48 = vadd.f32 %v558_v42, %v547_v45 }
 0x32b   :  { %v565_v44 = vsel %vm564_vm8, %v561_v15, %v563_v43 }
 0x32c   :  { %v570_v46 = vmul.f32 %v568_v27, %v565_v44 }
 0x32e   :  { %v575_v49 = vpop.permute.xlu1 %574  ;;  %v571_v52 = vadd.f32 %v570_v46, %v559_v48 }
 0x32f   :  { %v577_v50 = vsel %vm576_vm9, %v573_v47, %v575_v49 }
 0x330   :  { %v582_v51 = vmul.f32 %v580_v38, %v577_v50 }
 0x332   :  { %v583_v53 = vadd.f32 %v582_v51, %v571_v52 }
 0x334   :  { %584 = vst [vmem:[#allocation2] sm:$0xff] %v583_v53 }
 0x335   :  { %795 = shalt.err (!%p792_p4)
}
 0x336   :  { %594 = dma.vmem_to_hbm [thread:$0]  %s592_s8, 128, %s1033_s9, [#allocation3]  }
 0x337   :  { %804 = dma.done.wait [#allocation3], 128  }
 0x338   :  { %805 = vsyncadd [#allocation3], 4294967168 }
 0x339   :  { %598 = vsyncpa [#allocation3], 1 }

</bundles_post_ra>
